<compile_context>
chip_gen: v7x
topology: tpu7x:2x2x1
jax: 0.10.0
libtpu: 0.0.40
codegen_flags: <defaults>
</compile_context>

<pallas_src>
import numpy as np
import jax
import jax.numpy as jnp
from jax.experimental import pallas as pl
from jax.experimental.pallas import tpu as pltpu


# ----------------------------------------------------------------------------
# Fused kernel: three stages of   relu( bias + sum_k A_k @ Y @ W_k )
# ----------------------------------------------------------------------------
def _audbl_fused_kernel(x_ref,
                        a1_ref, w1_ref, b1_ref,
                        a2_ref, w2_ref, b2_ref,
                        a3_ref, w3_ref, b3_ref,
                        o_ref):
    def stage(y, a_ref, w_ref, b_ref):
        rows = a_ref.shape[1]
        cout = w_ref.shape[2]
        # Start the f32 accumulator at the (broadcast) bias; taps accumulate on top.
        acc = jnp.broadcast_to(b_ref[...], (rows, cout)).astype(jnp.float32)
        for k in range(a_ref.shape[0]):                 # static, tiny (3 or 4 taps)
            picked = jnp.dot(a_ref[k], y, preferred_element_type=jnp.float32)
            acc = acc + jnp.dot(picked, w_ref[k],
                                preferred_element_type=jnp.float32)
        return jnp.maximum(acc, 0.0)

    y1 = stage(x_ref[...], a1_ref, w1_ref, b1_ref)      # (N*L1, 64)   conv1 + relu
    y2 = stage(y1, a2_ref, w2_ref, b2_ref)              # (N*L2, 128)  conv2 + relu
    out = stage(y2, a3_ref, w3_ref, b3_ref)             # (N, 128)     linear + relu
    o_ref[...] = out.astype(o_ref.dtype)


def _matmul_flops(m, k, n):
    return 2 * m * k * n


def _fused_call(x2d, a1, w1s, b1, a2, w2s, b2, a3, w3s, b3):
    n_batch = a3.shape[1]
    d_out = w3s.shape[2]
    operands = (x2d, a1, w1s, b1, a2, w2s, b2, a3, w3s, b3)

    # Shape-derived cost estimate (per-tap selection matmul + per-tap weight matmul).
    flops = 0
    for a, w, y_cols in ((a1, w1s, x2d.shape[1]),
                         (a2, w2s, w1s.shape[2]),
                         (a3, w3s, w2s.shape[2])):
        k_taps, rows, cols = a.shape
        flops += k_taps * (_matmul_flops(rows, cols, y_cols)
                           + _matmul_flops(rows, y_cols, w.shape[2]))
    bytes_accessed = sum(int(np.prod(o.shape)) * o.dtype.itemsize for o in operands)
    bytes_accessed += n_batch * d_out * 4

    vmem = lambda: pl.BlockSpec(memory_space=pltpu.MemorySpace.VMEM)
    return pl.pallas_call(
        _audbl_fused_kernel,
        out_shape=jax.ShapeDtypeStruct((n_batch, d_out), jnp.float32),
        in_specs=[vmem() for _ in range(len(operands))],
        out_specs=vmem(),
        cost_estimate=pl.CostEstimate(
            flops=int(flops), transcendentals=0, bytes_accessed=int(bytes_accessed)),
    )(*operands)


# ----------------------------------------------------------------------------
# One-time parameter preparation (outside the per-call path)
# ----------------------------------------------------------------------------
def _conv_selectors(n, l_in, k_size, stride, padding):
    """0/1 matrices: (A_k @ X)[b*l_out+l] = X[b*l_in + stride*l + k - pad] (0 if OOB)."""
    l_out = (l_in + 2 * padding - k_size) // stride + 1
    sel = np.zeros((k_size, n * l_out, n * l_in), np.float32)
    for k in range(k_size):
        for b in range(n):
            for l in range(l_out):
                j = stride * l + k - padding
                if 0 <= j < l_in:
                    sel[k, b * l_out + l, b * l_in + j] = 1.0
    return jnp.asarray(sel), l_out


def _row_selectors(n, l_out):
    """(A_l @ Y)[b] = Y[b*l_out + l] — picks one spatial position per batch row."""
    sel = np.zeros((l_out, n, n * l_out), np.float32)
    for l in range(l_out):
        for b in range(n):
            sel[l, b, b * l_out + l] = 1.0
    return jnp.asarray(sel)


def prepare_params(w1, b1, w2, b2, w3, b3, *, n, l_in):
    """Re-lay-out PyTorch-convention weights for the fused kernel (done once)."""
    a1, l1 = _conv_selectors(n, l_in, k_size=3, stride=2, padding=1)
    a2, l2 = _conv_selectors(n, l1, k_size=3, stride=2, padding=1)
    a3 = _row_selectors(n, l2)

    # Conv weights (Cout, Cin, K) -> per-tap (K, Cin, Cout) slices.
    w1s = jnp.transpose(w1, (2, 1, 0))                       # (3, 30, 64)
    w2s = jnp.transpose(w2, (2, 1, 0))                       # (3, 64, 128)

    # Linear weight (Dout, Cin*L2) with torch flatten order (c, l2)
    #   -> per-position (L2, Cin, Dout) slices.
    d_out = w3.shape[0]
    c_in3 = w2.shape[0]                                      # conv2 out channels
    w3s = jnp.transpose(w3.reshape(d_out, c_in3, l2), (2, 1, 0))  # (L2, 128, 128)

    return (a1, w1s, b1.reshape(1, -1),
            a2, w2s, b2.reshape(1, -1),
            a3, w3s, b3.reshape(1, -1))


# ----------------------------------------------------------------------------
# Forward (single jit: one tiny input transpose + one fused pallas_call)
# ----------------------------------------------------------------------------
@jax.jit
def aud_bl_forward(x, prepared):
    n, c, l = x.shape
    # NCW -> rows = (batch, position), columns = channels.
    x2d = jnp.transpose(x, (0, 2, 1)).reshape(n * l, c)
    return _fused_call(x2d, *prepared)


# ----------------------------------------------------------------------------
# Pure-JAX reference (PyTorch semantics) for a correctness check
# ----------------------------------------------------------------------------
def _reference_forward(x, w1, b1, w2, b2, w3, b3):
    def conv_relu(x, w, b, stride, padding):
        n, c_in, l = x.shape
        c_out, _, k = w.shape
        xp = jnp.pad(x, ((0, 0), (0, 0), (padding, padding)))
        l_out = (l + 2 * padding - k) // stride + 1
        idx = (jnp.arange(l_out) * stride)[:, None] + jnp.arange(k)[None, :]
        patches = xp[:, :, idx].transpose(0, 2, 1, 3).reshape(n * l_out, c_in * k)
        y = patches @ w.reshape(c_out, c_in * k).T + b
        return jnp.maximum(y, 0.0).reshape(n, l_out, c_out).transpose(0, 2, 1)

    y1 = conv_relu(x, w1, b1, 2, 1)
    y2 = conv_relu(y1, w2, b2, 2, 1)
    flat = y2.reshape(x.shape[0], -1)                        # torch.flatten on NCW
    return jnp.maximum(flat @ w3.T + b3, 0.0)


if __name__ == "__main__":
    # Small shapes: batch=2, in_channels=30 (fixed by conv1), length=16.
    N, C_IN, L = 2, 30, 16
    L1 = (L + 2 * 1 - 3) // 2 + 1    # 8
    L2 = (L1 + 2 * 1 - 3) // 2 + 1   # 4  -> flatten dim = 128 * 4 = 512

    key = jax.random.PRNGKey(0)
    keys = jax.random.split(key, 7)
    w1 = jax.random.normal(keys[0], (64, 30, 3), dtype=jnp.float32) * 0.10
    b1 = jax.random.normal(keys[1], (64,), dtype=jnp.float32) * 0.10
    w2 = jax.random.normal(keys[2], (128, 64, 3), dtype=jnp.float32) * 0.05
    b2 = jax.random.normal(keys[3], (128,), dtype=jnp.float32) * 0.05
    w3 = jax.random.normal(keys[4], (128, 128 * L2), dtype=jnp.float32) * 0.02
    b3 = jax.random.normal(keys[5], (128,), dtype=jnp.float32) * 0.02
    x = jax.random.normal(keys[6], (N, C_IN, L), dtype=jnp.float32)

    prepared = prepare_params(w1, b1, w2, b2, w3, b3, n=N, l_in=L)

    out = aud_bl_forward(x, prepared)
    out = jax.block_until_ready(out)
    assert out.shape == (N, 128), out.shape
    assert bool(jnp.all(out >= 0.0))                          # final ReLU

    ref = _reference_forward(x, w1, b1, w2, b2, w3, b3)
    assert bool(jnp.allclose(out, ref, rtol=1e-2, atol=1e-2)), \
        float(jnp.max(jnp.abs(out - ref)))
    print("KERNEL_OK")
</pallas_src>

<mosaic_0001>
module attributes {stable_mosaic.version = 11 : i64} {
  func.func @_audbl_fused_kernel(%arg0: memref<32x30xf32, #tpu.memory_space<vmem>>, %arg1: memref<3x16x32xf32, #tpu.memory_space<vmem>>, %arg2: memref<3x30x64xf32, #tpu.memory_space<vmem>>, %arg3: memref<1x64xf32, #tpu.memory_space<vmem>>, %arg4: memref<3x8x16xf32, #tpu.memory_space<vmem>>, %arg5: memref<3x64x128xf32, #tpu.memory_space<vmem>>, %arg6: memref<1x128xf32, #tpu.memory_space<vmem>>, %arg7: memref<4x2x8xf32, #tpu.memory_space<vmem>>, %arg8: memref<4x128x128xf32, #tpu.memory_space<vmem>>, %arg9: memref<1x128xf32, #tpu.memory_space<vmem>>, %arg10: memref<2x128xf32, #tpu.memory_space<vmem>>) attributes {dimension_semantics = [], scalar_prefetch = 0 : i64, scratch_operands = 0 : i64, tpu.core_type = #tpu.core_type<tc>} {
    %c0 = arith.constant 0 : index
    %c0_0 = arith.constant 0 : index
    %0 = vector.load %arg0[%c0, %c0_0] : memref<32x30xf32, #tpu.memory_space<vmem>>, vector<32x30xf32>
    %c0_1 = arith.constant 0 : index
    %c0_2 = arith.constant 0 : index
    %1 = vector.load %arg3[%c0_1, %c0_2] : memref<1x64xf32, #tpu.memory_space<vmem>>, vector<1x64xf32>
    %2 = vector.shape_cast %1 : vector<1x64xf32> to vector<1x64xf32>
    %3 = vector.broadcast %2 : vector<1x64xf32> to vector<16x64xf32>
    %c0_3 = arith.constant 0 : index
    %c0_4 = arith.constant 0 : index
    %c0_5 = arith.constant 0 : index
    %4 = vector.load %arg1[%c0_3, %c0_4, %c0_5] : memref<3x16x32xf32, #tpu.memory_space<vmem>>, vector<1x16x32xf32>
    %5 = vector.shape_cast %4 : vector<1x16x32xf32> to vector<16x32xf32>
    %cst = arith.constant dense<0.000000e+00> : vector<16x30xf32>
    %6 = tpu.matmul %5, %0, %cst {dimension_numbers = #tpu.dot_dimension_numbers<[1], [0], [0], [1], [0, 0, 1, 1], [], []>} : vector<16x32xf32>, vector<32x30xf32>, vector<16x30xf32> -> vector<16x30xf32>
    %c0_6 = arith.constant 0 : index
    %c0_7 = arith.constant 0 : index
    %c0_8 = arith.constant 0 : index
    %7 = vector.load %arg2[%c0_6, %c0_7, %c0_8] : memref<3x30x64xf32, #tpu.memory_space<vmem>>, vector<1x30x64xf32>
    %8 = vector.shape_cast %7 : vector<1x30x64xf32> to vector<30x64xf32>
    %cst_9 = arith.constant dense<0.000000e+00> : vector<16x64xf32>
    %9 = tpu.matmul %6, %8, %cst_9 {dimension_numbers = #tpu.dot_dimension_numbers<[1], [0], [0], [1], [0, 0, 1, 1], [], []>} : vector<16x30xf32>, vector<30x64xf32>, vector<16x64xf32> -> vector<16x64xf32>
    %10 = arith.addf %3, %9 : vector<16x64xf32>
    %c1 = arith.constant 1 : index
    %c0_10 = arith.constant 0 : index
    %c0_11 = arith.constant 0 : index
    %11 = vector.load %arg1[%c1, %c0_10, %c0_11] : memref<3x16x32xf32, #tpu.memory_space<vmem>>, vector<1x16x32xf32>
    %12 = vector.shape_cast %11 : vector<1x16x32xf32> to vector<16x32xf32>
    %cst_12 = arith.constant dense<0.000000e+00> : vector<16x30xf32>
    %13 = tpu.matmul %12, %0, %cst_12 {dimension_numbers = #tpu.dot_dimension_numbers<[1], [0], [0], [1], [0, 0, 1, 1], [], []>} : vector<16x32xf32>, vector<32x30xf32>, vector<16x30xf32> -> vector<16x30xf32>
    %c1_13 = arith.constant 1 : index
    %c0_14 = arith.constant 0 : index
    %c0_15 = arith.constant 0 : index
    %14 = vector.load %arg2[%c1_13, %c0_14, %c0_15] : memref<3x30x64xf32, #tpu.memory_space<vmem>>, vector<1x30x64xf32>
    %15 = vector.shape_cast %14 : vector<1x30x64xf32> to vector<30x64xf32>
    %cst_16 = arith.constant dense<0.000000e+00> : vector<16x64xf32>
    %16 = tpu.matmul %13, %15, %cst_16 {dimension_numbers = #tpu.dot_dimension_numbers<[1], [0], [0], [1], [0, 0, 1, 1], [], []>} : vector<16x30xf32>, vector<30x64xf32>, vector<16x64xf32> -> vector<16x64xf32>
    %17 = arith.addf %10, %16 : vector<16x64xf32>
    %c2 = arith.constant 2 : index
    %c0_17 = arith.constant 0 : index
    %c0_18 = arith.constant 0 : index
    %18 = vector.load %arg1[%c2, %c0_17, %c0_18] : memref<3x16x32xf32, #tpu.memory_space<vmem>>, vector<1x16x32xf32>
    %19 = vector.shape_cast %18 : vector<1x16x32xf32> to vector<16x32xf32>
    %cst_19 = arith.constant dense<0.000000e+00> : vector<16x30xf32>
    %20 = tpu.matmul %19, %0, %cst_19 {dimension_numbers = #tpu.dot_dimension_numbers<[1], [0], [0], [1], [0, 0, 1, 1], [], []>} : vector<16x32xf32>, vector<32x30xf32>, vector<16x30xf32> -> vector<16x30xf32>
    %c2_20 = arith.constant 2 : index
    %c0_21 = arith.constant 0 : index
    %c0_22 = arith.constant 0 : index
    %21 = vector.load %arg2[%c2_20, %c0_21, %c0_22] : memref<3x30x64xf32, #tpu.memory_space<vmem>>, vector<1x30x64xf32>
    %22 = vector.shape_cast %21 : vector<1x30x64xf32> to vector<30x64xf32>
    %cst_23 = arith.constant dense<0.000000e+00> : vector<16x64xf32>
    %23 = tpu.matmul %20, %22, %cst_23 {dimension_numbers = #tpu.dot_dimension_numbers<[1], [0], [0], [1], [0, 0, 1, 1], [], []>} : vector<16x30xf32>, vector<30x64xf32>, vector<16x64xf32> -> vector<16x64xf32>
    %24 = arith.addf %17, %23 : vector<16x64xf32>
    %cst_24 = arith.constant 0.000000e+00 : f32
    %25 = vector.broadcast %cst_24 : f32 to vector<16x64xf32>
    %26 = arith.maximumf %24, %25 : vector<16x64xf32>
    %c0_25 = arith.constant 0 : index
    %c0_26 = arith.constant 0 : index
    %27 = vector.load %arg6[%c0_25, %c0_26] : memref<1x128xf32, #tpu.memory_space<vmem>>, vector<1x128xf32>
    %28 = vector.shape_cast %27 : vector<1x128xf32> to vector<1x128xf32>
    %29 = vector.broadcast %28 : vector<1x128xf32> to vector<8x128xf32>
    %c0_27 = arith.constant 0 : index
    %c0_28 = arith.constant 0 : index
    %c0_29 = arith.constant 0 : index
    %30 = vector.load %arg4[%c0_27, %c0_28, %c0_29] : memref<3x8x16xf32, #tpu.memory_space<vmem>>, vector<1x8x16xf32>
    %31 = vector.shape_cast %30 : vector<1x8x16xf32> to vector<8x16xf32>
    %cst_30 = arith.constant dense<0.000000e+00> : vector<8x64xf32>
    %32 = tpu.matmul %31, %26, %cst_30 {dimension_numbers = #tpu.dot_dimension_numbers<[1], [0], [0], [1], [0, 0, 1, 1], [], []>} : vector<8x16xf32>, vector<16x64xf32>, vector<8x64xf32> -> vector<8x64xf32>
    %c0_31 = arith.constant 0 : index
    %c0_32 = arith.constant 0 : index
    %c0_33 = arith.constant 0 : index
    %33 = vector.load %arg5[%c0_31, %c0_32, %c0_33] : memref<3x64x128xf32, #tpu.memory_space<vmem>>, vector<1x64x128xf32>
    %34 = vector.shape_cast %33 : vector<1x64x128xf32> to vector<64x128xf32>
    %cst_34 = arith.constant dense<0.000000e+00> : vector<8x128xf32>
    %35 = tpu.matmul %32, %34, %cst_34 {dimension_numbers = #tpu.dot_dimension_numbers<[1], [0], [0], [1], [0, 0, 1, 1], [], []>} : vector<8x64xf32>, vector<64x128xf32>, vector<8x128xf32> -> vector<8x128xf32>
    %36 = arith.addf %29, %35 : vector<8x128xf32>
    %c1_35 = arith.constant 1 : index
    %c0_36 = arith.constant 0 : index
    %c0_37 = arith.constant 0 : index
    %37 = vector.load %arg4[%c1_35, %c0_36, %c0_37] : memref<3x8x16xf32, #tpu.memory_space<vmem>>, vector<1x8x16xf32>
    %38 = vector.shape_cast %37 : vector<1x8x16xf32> to vector<8x16xf32>
    %cst_38 = arith.constant dense<0.000000e+00> : vector<8x64xf32>
    %39 = tpu.matmul %38, %26, %cst_38 {dimension_numbers = #tpu.dot_dimension_numbers<[1], [0], [0], [1], [0, 0, 1, 1], [], []>} : vector<8x16xf32>, vector<16x64xf32>, vector<8x64xf32> -> vector<8x64xf32>
    %c1_39 = arith.constant 1 : index
    %c0_40 = arith.constant 0 : index
    %c0_41 = arith.constant 0 : index
    %40 = vector.load %arg5[%c1_39, %c0_40, %c0_41] : memref<3x64x128xf32, #tpu.memory_space<vmem>>, vector<1x64x128xf32>
    %41 = vector.shape_cast %40 : vector<1x64x128xf32> to vector<64x128xf32>
    %cst_42 = arith.constant dense<0.000000e+00> : vector<8x128xf32>
    %42 = tpu.matmul %39, %41, %cst_42 {dimension_numbers = #tpu.dot_dimension_numbers<[1], [0], [0], [1], [0, 0, 1, 1], [], []>} : vector<8x64xf32>, vector<64x128xf32>, vector<8x128xf32> -> vector<8x128xf32>
    %43 = arith.addf %36, %42 : vector<8x128xf32>
    %c2_43 = arith.constant 2 : index
    %c0_44 = arith.constant 0 : index
    %c0_45 = arith.constant 0 : index
    %44 = vector.load %arg4[%c2_43, %c0_44, %c0_45] : memref<3x8x16xf32, #tpu.memory_space<vmem>>, vector<1x8x16xf32>
    %45 = vector.shape_cast %44 : vector<1x8x16xf32> to vector<8x16xf32>
    %cst_46 = arith.constant dense<0.000000e+00> : vector<8x64xf32>
    %46 = tpu.matmul %45, %26, %cst_46 {dimension_numbers = #tpu.dot_dimension_numbers<[1], [0], [0], [1], [0, 0, 1, 1], [], []>} : vector<8x16xf32>, vector<16x64xf32>, vector<8x64xf32> -> vector<8x64xf32>
    %c2_47 = arith.constant 2 : index
    %c0_48 = arith.constant 0 : index
    %c0_49 = arith.constant 0 : index
    %47 = vector.load %arg5[%c2_47, %c0_48, %c0_49] : memref<3x64x128xf32, #tpu.memory_space<vmem>>, vector<1x64x128xf32>
    %48 = vector.shape_cast %47 : vector<1x64x128xf32> to vector<64x128xf32>
    %cst_50 = arith.constant dense<0.000000e+00> : vector<8x128xf32>
    %49 = tpu.matmul %46, %48, %cst_50 {dimension_numbers = #tpu.dot_dimension_numbers<[1], [0], [0], [1], [0, 0, 1, 1], [], []>} : vector<8x64xf32>, vector<64x128xf32>, vector<8x128xf32> -> vector<8x128xf32>
    %50 = arith.addf %43, %49 : vector<8x128xf32>
    %cst_51 = arith.constant 0.000000e+00 : f32
    %51 = vector.broadcast %cst_51 : f32 to vector<8x128xf32>
    %52 = arith.maximumf %50, %51 : vector<8x128xf32>
    %c0_52 = arith.constant 0 : index
    %c0_53 = arith.constant 0 : index
    %53 = vector.load %arg9[%c0_52, %c0_53] : memref<1x128xf32, #tpu.memory_space<vmem>>, vector<1x128xf32>
    %54 = vector.shape_cast %53 : vector<1x128xf32> to vector<1x128xf32>
    %55 = vector.broadcast %54 : vector<1x128xf32> to vector<2x128xf32>
    %c0_54 = arith.constant 0 : index
    %c0_55 = arith.constant 0 : index
    %c0_56 = arith.constant 0 : index
    %56 = vector.load %arg7[%c0_54, %c0_55, %c0_56] : memref<4x2x8xf32, #tpu.memory_space<vmem>>, vector<1x2x8xf32>
    %57 = vector.shape_cast %56 : vector<1x2x8xf32> to vector<2x8xf32>
    %cst_57 = arith.constant dense<0.000000e+00> : vector<2x128xf32>
    %58 = tpu.matmul %57, %52, %cst_57 {dimension_numbers = #tpu.dot_dimension_numbers<[1], [0], [0], [1], [0, 0, 1, 1], [], []>} : vector<2x8xf32>, vector<8x128xf32>, vector<2x128xf32> -> vector<2x128xf32>
    %c0_58 = arith.constant 0 : index
    %c0_59 = arith.constant 0 : index
    %c0_60 = arith.constant 0 : index
    %59 = vector.load %arg8[%c0_58, %c0_59, %c0_60] : memref<4x128x128xf32, #tpu.memory_space<vmem>>, vector<1x128x128xf32>
    %60 = vector.shape_cast %59 : vector<1x128x128xf32> to vector<128x128xf32>
    %cst_61 = arith.constant dense<0.000000e+00> : vector<2x128xf32>
    %61 = tpu.matmul %58, %60, %cst_61 {dimension_numbers = #tpu.dot_dimension_numbers<[1], [0], [0], [1], [0, 0, 1, 1], [], []>} : vector<2x128xf32>, vector<128x128xf32>, vector<2x128xf32> -> vector<2x128xf32>
    %62 = arith.addf %55, %61 : vector<2x128xf32>
    %c1_62 = arith.constant 1 : index
    %c0_63 = arith.constant 0 : index
    %c0_64 = arith.constant 0 : index
    %63 = vector.load %arg7[%c1_62, %c0_63, %c0_64] : memref<4x2x8xf32, #tpu.memory_space<vmem>>, vector<1x2x8xf32>
    %64 = vector.shape_cast %63 : vector<1x2x8xf32> to vector<2x8xf32>
    %cst_65 = arith.constant dense<0.000000e+00> : vector<2x128xf32>
    %65 = tpu.matmul %64, %52, %cst_65 {dimension_numbers = #tpu.dot_dimension_numbers<[1], [0], [0], [1], [0, 0, 1, 1], [], []>} : vector<2x8xf32>, vector<8x128xf32>, vector<2x128xf32> -> vector<2x128xf32>
    %c1_66 = arith.constant 1 : index
    %c0_67 = arith.constant 0 : index
    %c0_68 = arith.constant 0 : index
    %66 = vector.load %arg8[%c1_66, %c0_67, %c0_68] : memref<4x128x128xf32, #tpu.memory_space<vmem>>, vector<1x128x128xf32>
    %67 = vector.shape_cast %66 : vector<1x128x128xf32> to vector<128x128xf32>
    %cst_69 = arith.constant dense<0.000000e+00> : vector<2x128xf32>
    %68 = tpu.matmul %65, %67, %cst_69 {dimension_numbers = #tpu.dot_dimension_numbers<[1], [0], [0], [1], [0, 0, 1, 1], [], []>} : vector<2x128xf32>, vector<128x128xf32>, vector<2x128xf32> -> vector<2x128xf32>
    %69 = arith.addf %62, %68 : vector<2x128xf32>
    %c2_70 = arith.constant 2 : index
    %c0_71 = arith.constant 0 : index
    %c0_72 = arith.constant 0 : index
    %70 = vector.load %arg7[%c2_70, %c0_71, %c0_72] : memref<4x2x8xf32, #tpu.memory_space<vmem>>, vector<1x2x8xf32>
    %71 = vector.shape_cast %70 : vector<1x2x8xf32> to vector<2x8xf32>
    %cst_73 = arith.constant dense<0.000000e+00> : vector<2x128xf32>
    %72 = tpu.matmul %71, %52, %cst_73 {dimension_numbers = #tpu.dot_dimension_numbers<[1], [0], [0], [1], [0, 0, 1, 1], [], []>} : vector<2x8xf32>, vector<8x128xf32>, vector<2x128xf32> -> vector<2x128xf32>
    %c2_74 = arith.constant 2 : index
    %c0_75 = arith.constant 0 : index
    %c0_76 = arith.constant 0 : index
    %73 = vector.load %arg8[%c2_74, %c0_75, %c0_76] : memref<4x128x128xf32, #tpu.memory_space<vmem>>, vector<1x128x128xf32>
    %74 = vector.shape_cast %73 : vector<1x128x128xf32> to vector<128x128xf32>
    %cst_77 = arith.constant dense<0.000000e+00> : vector<2x128xf32>
    %75 = tpu.matmul %72, %74, %cst_77 {dimension_numbers = #tpu.dot_dimension_numbers<[1], [0], [0], [1], [0, 0, 1, 1], [], []>} : vector<2x128xf32>, vector<128x128xf32>, vector<2x128xf32> -> vector<2x128xf32>
    %76 = arith.addf %69, %75 : vector<2x128xf32>
    %c3 = arith.constant 3 : index
    %c0_78 = arith.constant 0 : index
    %c0_79 = arith.constant 0 : index
    %77 = vector.load %arg7[%c3, %c0_78, %c0_79] : memref<4x2x8xf32, #tpu.memory_space<vmem>>, vector<1x2x8xf32>
    %78 = vector.shape_cast %77 : vector<1x2x8xf32> to vector<2x8xf32>
    %cst_80 = arith.constant dense<0.000000e+00> : vector<2x128xf32>
    %79 = tpu.matmul %78, %52, %cst_80 {dimension_numbers = #tpu.dot_dimension_numbers<[1], [0], [0], [1], [0, 0, 1, 1], [], []>} : vector<2x8xf32>, vector<8x128xf32>, vector<2x128xf32> -> vector<2x128xf32>
    %c3_81 = arith.constant 3 : index
    %c0_82 = arith.constant 0 : index
    %c0_83 = arith.constant 0 : index
    %80 = vector.load %arg8[%c3_81, %c0_82, %c0_83] : memref<4x128x128xf32, #tpu.memory_space<vmem>>, vector<1x128x128xf32>
    %81 = vector.shape_cast %80 : vector<1x128x128xf32> to vector<128x128xf32>
    %cst_84 = arith.constant dense<0.000000e+00> : vector<2x128xf32>
    %82 = tpu.matmul %79, %81, %cst_84 {dimension_numbers = #tpu.dot_dimension_numbers<[1], [0], [0], [1], [0, 0, 1, 1], [], []>} : vector<2x128xf32>, vector<128x128xf32>, vector<2x128xf32> -> vector<2x128xf32>
    %83 = arith.addf %76, %82 : vector<2x128xf32>
    %cst_85 = arith.constant 0.000000e+00 : f32
    %84 = vector.broadcast %cst_85 : f32 to vector<2x128xf32>
    %85 = arith.maximumf %83, %84 : vector<2x128xf32>
    %c0_86 = arith.constant 0 : index
    %c0_87 = arith.constant 0 : index
    %86 = vector.load %arg10[%c0_86, %c0_87] : memref<2x128xf32, #tpu.memory_space<vmem>>, vector<2x128xf32>
    tpu.vector_store %arg10[%c0_86, %c0_87], %85 {strides = array<i32>} : memref<2x128xf32, #tpu.memory_space<vmem>>, vector<2x128xf32>,
    return
  }
}

</mosaic_0001>

<bundles_post_ra>
// kernel: aud_bl_forward.1
= control target key start
LH: loop header
LB: loop body
LE: loop exit
PB: predicated region body
PF: predicated region fallthrough
CT: control target
= control target key end

     0   :  { %15 = vsyncpa [#allocation3], 0  ;;  %s3021_s0 = inlined_call_operand.hbm [shape: f32[32,30], index: 0, kind: input, shape index: {}]   ;;  %s3022_s1 = inlined_call_operand.hbm [shape: f32[3,16,32], index: 1, kind: input, shape index: {}]   ;;  %s3023_s2 = inlined_call_operand.hbm [shape: f32[3,30,64], index: 2, kind: input, shape index: {}]   ;;  %s3024_s3 = inlined_call_operand.vmem [shape: f32[1,64], index: 3, kind: input, shape index: {}]   ;;  %s3025_s4 = inlined_call_operand.hbm [shape: f32[3,8,16], index: 4, kind: input, shape index: {}]   ;;  %s3026_s5 = inlined_call_operand.hbm [shape: f32[3,64,128], index: 5, kind: input, shape index: {}]   ;;  %s3027_s6 = inlined_call_operand.vmem [shape: f32[1,128], index: 6, kind: input, shape index: {}]   ;;  %s3028_s7 = inlined_call_operand.vmem [shape: f32[4,2,8], index: 7, kind: input, shape index: {}]   ;;  %s3029_s8 = inlined_call_operand.hbm [shape: f32[4,128,128], index: 8, kind: input, shape index: {}]   ;;  %s3030_s9 = inlined_call_operand.vmem [shape: f32[1,128], index: 9, kind: input, shape index: {}]   ;;  %s3031_s10 = inlined_call_operand.hbm [shape: f32[2,128], index: 10, kind: output, shape index: {}]  }
   0x1   :  { %16 = vsyncpa [#allocation6], 0 }
   0x2   :  { %17 = vsyncpa [#allocation9], 0 }
   0x3   :  { %18 = vsyncpa [#allocation12], 0 }
   0x4   :  { %19 = vsyncpa [#allocation4], 0  ;;  %s2689_s13 = smov [#allocation5]   ;;  %s2690_s15 = smov [#allocation8]  }
   0x5   :  { %s37_s14 = sshll.u32 %s2689_s13, 4  ;;  %s63_s16 = sshll.u32 %s2690_s15, 4  ;;  %s38_s14 = int_to_ptr.vmem [resolvable:$true] %s37_s14  ;;  %s2757_s16 = int_to_ptr.vmem [resolvable:$true] %s63_s16 }
   0x6   :  { %s2525_s19 = scalar_lea.hbm %s3022_s1, 768 }
   0x7   :  { %p2526_p0 = scmp.ne.s32.totalorder %s3022_s1, %s2525_s19  ;;  %p2529_p1 = scmp.lt.u32.totalorder %s2525_s19, %s3022_s1 }
   0x9   :  { %p2531_p2 = pnand %p2529_p1, %p2526_p0 }
   0xb   :  { %2534 = shalt.err (!%p2531_p2)
}
   0xc   :  { %s2535_s24 = scalar_lea.vmem %s38_s14, 768  ;;  %p2540_p4 = scmp.lt.s32.totalorder %s38_s14, %s38_s14 }
   0xd   :  { %p2536_p3 = scmp.ne.s32.totalorder %s38_s14, %s2535_s24  ;;  %p2541_p5 = scmp.lt.s32.totalorder %s2535_s24, %s2535_s24 }
   0xf   :  { %p2542_p6 = por %p2541_p5, %p2540_p4 }
  0x11   :  { %p2543_p7 = pnand %p2542_p6, %p2536_p3 }
  0x13   :  { %2546 = shalt.err (!%p2543_p7)
}
  0x14   :  { %s2691_s25 = smov 128   ;;  %s2692_s26 = smov 8  }
  0x15   :  { %43 = dma.hbm_to_vmem [thread:$0]  %s3022_s1, 768, %s38_s14, [#allocation6], %s2691_s25, %s2691_s25, %s2692_s26  }
  0x16   :  { %s2547_s11 = scalar_lea.hbm %s3025_s4, 384 }
  0x17   :  { %p2548_p8 = scmp.ne.s32.totalorder %s3025_s4, %s2547_s11  ;;  %p2551_p9 = scmp.lt.u32.totalorder %s2547_s11, %s3025_s4 }
  0x19   :  { %p2553_p10 = pnand %p2551_p9, %p2548_p8 }
  0x1b   :  { %2556 = shalt.err (!%p2553_p10)
}
  0x1c   :  { %s2557_s18 = scalar_lea.vmem %s2757_s16, 384  ;;  %p2562_p12 = scmp.lt.s32.totalorder %s2757_s16, %s2757_s16 }
  0x1d   :  { %p2558_p11 = scmp.ne.s32.totalorder %s2757_s16, %s2557_s18  ;;  %p2563_p13 = scmp.lt.s32.totalorder %s2557_s18, %s2557_s18 }
  0x1f   :  { %p2564_p0 = por %p2563_p13, %p2562_p12 }
  0x21   :  { %p2565_p1 = pnand %p2564_p0, %p2558_p11 }
  0x23   :  { %2568 = shalt.err (!%p2565_p1)
}
  0x24   :  { %69 = dma.hbm_to_vmem [thread:$0]  %s3025_s4, 384, %s2757_s16, [#allocation9], %s2691_s25, %s2691_s25, %s2692_s26  }
  0x25   :  { %s2693_s19 = smov [#allocation2]   ;;  %s2694_s21 = smov [#allocation7]  }
  0x26   :  { %s25_s20 = sshll.u32 %s2693_s19, 4  ;;  %s49_s22 = sshll.u32 %s2694_s21, 4  ;;  %s26_s20 = int_to_ptr.vmem [resolvable:$true] %s25_s20  ;;  %s2794_s22 = int_to_ptr.vmem [resolvable:$true] %s49_s22 }
  0x27   :  { %s2569_s27 = scalar_lea.hbm %s3021_s0, 512 }
  0x28   :  { %p2570_p2 = scmp.ne.s32.totalorder %s3021_s0, %s2569_s27  ;;  %p2573_p3 = scmp.lt.u32.totalorder %s2569_s27, %s3021_s0 }
  0x2a   :  { %p2575_p4 = pnand %p2573_p3, %p2570_p2 }
  0x2c   :  { %2578 = shalt.err (!%p2575_p4)
}
  0x2d   :  { %s2579_s4 = scalar_lea.vmem %s26_s20, 512  ;;  %p2584_p6 = scmp.lt.s32.totalorder %s26_s20, %s26_s20 }
  0x2e   :  { %p2580_p5 = scmp.ne.s32.totalorder %s26_s20, %s2579_s4  ;;  %p2585_p7 = scmp.lt.s32.totalorder %s2579_s4, %s2579_s4 }
  0x30   :  { %p2586_p8 = por %p2585_p7, %p2584_p6 }
  0x32   :  { %p2587_p9 = pnand %p2586_p8, %p2580_p5 }
  0x34   :  { %2590 = shalt.err (!%p2587_p9)
}
  0x35   :  { %31 = dma.hbm_to_vmem [thread:$0]  %s3021_s0, 512, %s26_s20, [#allocation3], %s2691_s25, %s2691_s25, %s2692_s26  }
  0x36   :  { %s2591_s17 = scalar_lea.hbm %s3023_s2, 1536 }
  0x37   :  { %p2592_p10 = scmp.ne.s32.totalorder %s3023_s2, %s2591_s17  ;;  %p2595_p11 = scmp.lt.u32.totalorder %s2591_s17, %s3023_s2 }
  0x39   :  { %p2597_p12 = pnand %p2595_p11, %p2592_p10 }
  0x3b   :  { %2600 = shalt.err (!%p2597_p12)
}
  0x3c   :  { %s2601_s21 = scalar_lea.vmem %s2794_s22, 1536  ;;  %p2606_p0 = scmp.lt.s32.totalorder %s2794_s22, %s2794_s22 }
  0x3d   :  { %p2602_p13 = scmp.ne.s32.totalorder %s2794_s22, %s2601_s21  ;;  %p2607_p1 = scmp.lt.s32.totalorder %s2601_s21, %s2601_s21 }
  0x3f   :  { %p2608_p2 = por %p2607_p1, %p2606_p0 }
  0x41   :  { %p2609_p3 = pnand %p2608_p2, %p2602_p13 }
  0x43   :  { %2612 = shalt.err (!%p2609_p3)
}
  0x44   :  { %55 = dma.hbm_to_vmem [thread:$0]  %s3023_s2, 1536, %s2794_s22, [#allocation6], %s2691_s25, %s2691_s25, %s2692_s26  }
  0x45   :  { %s2695_s23 = smov [#allocation10]   ;;  %s2696_s27 = smov [#allocation11]  }
  0x46   :  { %s75_s24 = sshll.u32 %s2695_s23, 4  ;;  %s91_s28 = sshll.u32 %s2696_s27, 4  ;;  %s76_s24 = int_to_ptr.vmem [resolvable:$true] %s75_s24  ;;  %s2831_s28 = int_to_ptr.vmem [resolvable:$true] %s91_s28 }
  0x47   :  { %s2613_s11 = scalar_lea.hbm %s3026_s5, 3072 }
  0x48   :  { %p2614_p4 = scmp.ne.s32.totalorder %s3026_s5, %s2613_s11  ;;  %p2617_p5 = scmp.lt.u32.totalorder %s2613_s11, %s3026_s5 }
  0x4a   :  { %p2619_p6 = pnand %p2617_p5, %p2614_p4 }
  0x4c   :  { %2622 = shalt.err (!%p2619_p6)
}
  0x4d   :  { %s2623_s2 = scalar_lea.vmem %s76_s24, 3072  ;;  %p2628_p8 = scmp.lt.s32.totalorder %s76_s24, %s76_s24 }
  0x4e   :  { %p2624_p7 = scmp.ne.s32.totalorder %s76_s24, %s2623_s2  ;;  %p2629_p9 = scmp.lt.s32.totalorder %s2623_s2, %s2623_s2 }
  0x50   :  { %p2630_p10 = por %p2629_p9, %p2628_p8 }
  0x52   :  { %p2631_p11 = pnand %p2630_p10, %p2624_p7 }
  0x54   :  { %2634 = shalt.err (!%p2631_p11)
}
  0x55   :  { %81 = dma.hbm_to_vmem [thread:$0]  %s3026_s5, 3072, %s76_s24, [#allocation9], %s2691_s25, %s2691_s25, %s2692_s26  }
  0x56   :  { %s2635_s1 = scalar_lea.hbm %s3029_s8, 8192 }
  0x57   :  { %p2636_p12 = scmp.ne.s32.totalorder %s3029_s8, %s2635_s1  ;;  %p2639_p13 = scmp.lt.u32.totalorder %s2635_s1, %s3029_s8 }
  0x59   :  { %p2641_p0 = pnand %p2639_p13, %p2636_p12 }
  0x5b   :  { %2644 = shalt.err (!%p2641_p0)
}
  0x5c   :  { %s2645_s20 = scalar_lea.vmem %s2831_s28, 8192  ;;  %p2650_p2 = scmp.lt.s32.totalorder %s2831_s28, %s2831_s28 }
  0x5d   :  { %p2646_p1 = scmp.ne.s32.totalorder %s2831_s28, %s2645_s20  ;;  %p2651_p3 = scmp.lt.s32.totalorder %s2645_s20, %s2645_s20 }
  0x5f   :  { %p2652_p4 = por %p2651_p3, %p2650_p2 }
  0x61   :  { %p2653_p5 = pnand %p2652_p4, %p2646_p1 }
  0x63   :  { %2656 = shalt.err (!%p2653_p5)
}
  0x64   :  { %97 = dma.hbm_to_vmem [thread:$0]  %s3029_s8, 8192, %s2831_s28, [#allocation12], %s2691_s25, %s2691_s25, %s2692_s26  }
  0x65   :  { %2679 = dma.done.wait [#allocation3], 512  }
  0x66   :  { %2680 = vsyncadd [#allocation3], 4294966784 }
  0x67   :  { %2681 = dma.done.wait [#allocation6], 2304  }
  0x68   :  { %2682 = vsyncadd [#allocation6], 4294964992 }
  0x69   :  { %2683 = dma.done.wait [#allocation9], 3456  }
  0x6a   :  { %2684 = vsyncadd [#allocation9], 4294963840 }
  0x6b   :  { %2685 = dma.done.wait [#allocation12], 8192  }
  0x6c   :  { %2686 = vsyncadd [#allocation12], 4294959104  ;;  %vm131_vm0 = vcmask 261120   ;;  %v118_v0 = vld [vmem:[#allocation2] sm:$0xff]  ;;  %v119_v1 = vld [vmem:[#allocation2 + $0x8] sm:$0xff]  ;;  %vm224_vm1 = vcmask 1045504  }
  0x6d   :  { %v120_v2 = vld [vmem:[#allocation2 + $0x10] sm:$0xff]  ;;  %v2300_v3 = vpack.c.bf16 %v119_v1, %v118_v0  ;;  %v121_v4 = vld [vmem:[#allocation2 + $0x18] sm:$0xff]  ;;  %v129_v5 = vld [vmem:[#allocation5] sm:$0xff]  ;;  %vm2697_vm2 = vmmov 1   ;;  %vm217_vm4 = vcmask 244736   ;;  %v2698_v37 = vmov 0.0|0.0  }
  0x6e   :  { %v2304_v6 = vpack.c.bf16 %v121_v4, %v120_v2  ;;  %2004 = vmatprep.mubr.msk.f32.mxu1 %vm131_vm0, %v129_v5  ;;  %v213_v7 = vld [vmem:[#allocation7] sm:$0xff]  ;;  %v214_v8 = vld [vmem:[#allocation7 + $0x8] sm:$0xff]  ;;  %v215_v10 = vld [vmem:[#allocation7 + $0x10] sm:$0xff]  ;;  %vm2699_vm5 = vmmov 0   ;;  %v2700_v38 = vmov 0.0   ;;  %vm665_vm6 = vcmask 130048  }
  0x6f   :  { %2301 = vmatprep.subr.bf16.mxu1 %v2300_v3  ;;  %2337 = vmatprep.subr.bf16.mxu0 %v2300_v3  ;;  %v2308_v9 = vpack.c.bf16 %v214_v8, %v213_v7  ;;  %v216_v11 = vld [vmem:[#allocation7 + $0x18] sm:$0x3f]  ;;  %vm2869_vm3 = vmpackc.low %vm224_vm1, %vm2697_vm2  ;;  %v481_v15 = vld [vmem:[#allocation5 + $0x20] sm:$0xff]  ;;  %vm747_vm7 = vcmask 523264   ;;  %vm1147_vm8 = vcmask 64512   ;;  %s2701_s12 = smov [#allocation13]  }
  0x70   :  { %2303 = vmatpush3.bf16.msra.mxu1 %v2300_v3  ;;  %2339 = vmatpush3.bf16.msra.mxu0 %v2300_v3  ;;  %v130_v12 = vld [vmem:[#allocation5 + $0x8] sm:$0xff]  ;;  %v2312_v13 = vpack.c.bf16 %v216_v11, %v215_v10  ;;  %v306_v19 = vld [vmem:[#allocation5 + $0x10] sm:$0xff]  ;;  %v391_v21 = vld [vmem:[#allocation7 + $0x28] sm:$0xff]  ;;  %s1805_s13 = sshll.u32 %s2701_s12, 4  ;;  %s1806_s13 = int_to_ptr.vmem [resolvable:$true] %s1805_s13 }
  0x71   :  { %2305 = vmatprep.subr.bf16.mxu1 %v2304_v6  ;;  %2341 = vmatprep.subr.bf16.mxu0 %v2304_v6  ;;  %v482_v16 = vld [vmem:[#allocation5 + $0x28] sm:$0xff]  ;;  %v390_v20 = vld [vmem:[#allocation7 + $0x20] sm:$0xff]  ;;  %v392_v23 = vld [vmem:[#allocation7 + $0x30] sm:$0xff]  ;;  %s2657_s2 = scalar_lea.vmem %s1806_s13, 32  ;;  %p2662_p7 = scmp.lt.s32.totalorder %s1806_s13, %s1806_s13 }
  0x72   :  { %2048 = vmatprep.mubr.msk.f32.mxu0 %vm131_vm0, %v481_v15  ;;  %v2326_v22 = vpack.c.bf16 %v391_v21, %v390_v20  ;;  %v393_v24 = vld [vmem:[#allocation7 + $0x38] sm:$0x3f]  ;;  %v307_v25 = vld [vmem:[#allocation5 + $0x18] sm:$0xff]  ;;  %v565_v27 = vld [vmem:[#allocation7 + $0x40] sm:$0xff]  ;;  %p2658_p6 = scmp.ne.s32.totalorder %s1806_s13, %s2657_s2  ;;  %p2663_p8 = scmp.lt.s32.totalorder %s2657_s2, %s2657_s2 }
  0x73   :  { %v2330_v26 = vpack.c.bf16 %v393_v24, %v392_v23  ;;  %v566_v28 = vld [vmem:[#allocation7 + $0x48] sm:$0xff]  ;;  %v567_v32 = vld [vmem:[#allocation7 + $0x50] sm:$0xff]  ;;  %v568_v33 = vld [vmem:[#allocation7 + $0x58] sm:$0x3f] }
  0x74   :  { %2307 = vmatpush3.bf16.msra.mxu1 %v2304_v6  ;;  %2343 = vmatpush3.bf16.msra.mxu0 %v2304_v6  ;;  %v2344_v29 = vpack.c.bf16 %v566_v28, %v565_v27  ;;  %v2348_v36 = vpack.c.bf16 %v568_v33, %v567_v32  ;;  %v739_v39 = vld [vmem:[#allocation10] sm:$0xff]  ;;  %v740_v40 = vld [vmem:[#allocation10 + $0x8] sm:$0xff]  ;;  %v741_v41 = vld [vmem:[#allocation10 + $0x10] sm:$0xff]  ;;  %p2664_p9 = por %p2663_p8, %p2662_p7 }
  0x75   :  { %2309 = vmatprep.subr.bf16.mxu1 %v2308_v9  ;;  %2354 = vmatprep.subr.bf16.mxu0 %v2698_v37  ;;  %v2358_v42 = vpack.c.bf16 %v740_v40, %v739_v39  ;;  %v742_v43 = vld [vmem:[#allocation10 + $0x18] sm:$0xff]  ;;  %v743_v45 = vld [vmem:[#allocation10 + $0x20] sm:$0xff]  ;;  %v744_v46 = vld [vmem:[#allocation10 + $0x28] sm:$0xff] }
  0x76   :  { %v2361_v44 = vpack.c.bf16 %v742_v43, %v741_v41  ;;  %v2364_v47 = vpack.c.bf16 %v744_v46, %v743_v45  ;;  %v745_v48 = vld [vmem:[#allocation10 + $0x30] sm:$0xff]  ;;  %v746_v49 = vld [vmem:[#allocation10 + $0x38] sm:$0xff]  ;;  %v664_v59 = vld [vmem:[#allocation8] sm:$0xff]  ;;  %p2665_p10 = pnand %p2664_p9, %p2658_p6 }
  0x77   :  { %2005 = vmatmul.mubr.msk.f32.vlgmr.msra.gmra.mrb[0].mxu1 %vm131_vm0, %v130_v12  ;;  %2049 = vmatmul.mubr.msk.f32.vlgmr.msra.gmra.mrb[0].mxu0 %vm131_vm0, %v482_v16  ;;  %v2367_v50 = vpack.c.bf16 %v746_v49, %v745_v48  ;;  %v1817_v51 = vld [vmem:[%s3024_s3] ss:$0 sm:$0xff]  ;;  %v823_v60 = vld [vmem:[#allocation8 + $0x8] sm:$0xff]  ;;  %v898_v62 = vld [vmem:[#allocation10 + $0x40] sm:$0xff] }
  0x78   :  { %2311 = vmatpush3.bf16.msra.mxu1 %v2308_v9  ;;  %2066 = vmatprep.mubr.msk.f32.mxu0 %vm2699_vm5, %v2700_v38  ;;  %v981_v61 = vld [vmem:[#allocation8 + $0x10] sm:$0xff]  ;;  %v899_v63 = vld [vmem:[#allocation10 + $0x48] sm:$0xff]  ;;  %v900_v1 = vld [vmem:[#allocation10 + $0x50] sm:$0xff] }
  0x79   :  { %2314 = vmatprep.subr.msk.bf16.mxu1 %vm2869_vm3, %v2312_v13  ;;  %v2373_v0 = vpack.c.bf16 %v899_v63, %v898_v62  ;;  %v901_v2 = vld [vmem:[#allocation10 + $0x58] sm:$0xff]  ;;  %v903_v7 = vld [vmem:[#allocation10 + $0x68] sm:$0xff]  ;;  %v904_v11 = vld [vmem:[#allocation10 + $0x70] sm:$0xff] }
  0x7a   :  { %v2376_v5 = vpack.c.bf16 %v901_v2, %v900_v1  ;;  %v905_v12 = vld [vmem:[#allocation10 + $0x78] sm:$0xff]  ;;  %v1056_v16 = vld [vmem:[#allocation10 + $0x80] sm:$0xff]  ;;  %v1061_v23 = vld [vmem:[#allocation10 + $0xa8] sm:$0xff] }
  0x7b   :  { %v2382_v15 = vpack.c.bf16 %v905_v12, %v904_v11  ;;  %v1059_v20 = vld [vmem:[#allocation10 + $0x98] sm:$0xff]  ;;  %v1221_v28 = vld [vmem:[#allocation11] sm:$0xff]  ;;  %v1227_v39 = vld [vmem:[#allocation11 + $0x30] sm:$0xff] }
  0x7c   :  { %2317 = vmatpush3.bf16.msk.msra.mxu1 %vm2869_vm3, %v2312_v13  ;;  %v1224_v32 = vld [vmem:[#allocation11 + $0x18] sm:$0xff]  ;;  %v1230_v43 = vld [vmem:[#allocation11 + $0x48] sm:$0xff]  ;;  %v1231_v45 = vld [vmem:[#allocation11 + $0x50] sm:$0xff] }
  0x7d   :  { %2319 = vmatprep.subr.bf16.mxu1 %v2300_v3  ;;  %v1228_v40 = vld [vmem:[#allocation11 + $0x38] sm:$0xff]  ;;  %v1233_v48 = vld [vmem:[#allocation11 + $0x60] sm:$0xff]  ;;  %v1234_v49 = vld [vmem:[#allocation11 + $0x68] sm:$0xff] }
  0x7e   :  { %v2409_v41 = vpack.c.bf16 %v1228_v40, %v1227_v39  ;;  %v1232_v46 = vld [vmem:[#allocation11 + $0x58] sm:$0xff]  ;;  %v1385_v62 = vld [vmem:[#allocation11 + $0x88] sm:$0xff]  ;;  %v1386_v63 = vld [vmem:[#allocation11 + $0x90] sm:$0xff] }
  0x7f   :  { %v1387_v1 = vld [vmem:[#allocation11 + $0x98] sm:$0xff]  ;;  %v1394_v12 = vld [vmem:[#allocation11 + $0xd0] sm:$0xff] }
  0x80   :  { %v2427_v2 = vpack.c.bf16 %v1387_v1, %v1386_v63  ;;  %v1554_v39 = vld [vmem:[#allocation11 + $0x138] sm:$0xff]  ;;  %v1714_v63 = vld [vmem:[#allocation11 + $0x1a0] sm:$0xff] }
 0x14a   :  { %v2006_v17 = vpop.f32.mrb[0].mxu1  ;;  %v2050_v30 = vpop.f32.mrb[0].mxu0 }
 0x14b   :  { %v204_v18 = vpop.f32.mrb[1].mxu1  ;;  %v555_v31 = vpop.f32.mrb[1].mxu0 }
 0x14c   :  { %2015 = vmatprep.mubr.msk.f32.mxu1 %vm217_vm4, %v204_v18 }
 0x14d   :  { %2016 = vmatmul.mubr.msk.f32.vlgmr.msra.gmra.mrb[2].mxu1 %vm217_vm4, %v2006_v17  ;;  %v1057_v17 = vld [vmem:[#allocation10 + $0x88] sm:$0xff] }
 0x14e   :  { %2321 = vmatpush3.bf16.msra.mxu1 %v2300_v3  ;;  %2026 = vmatprep.mubr.msk.f32.mxu1 %vm131_vm0, %v306_v19  ;;  %v2388_v18 = vpack.c.bf16 %v1057_v17, %v1056_v16  ;;  %v1058_v19 = vld [vmem:[#allocation10 + $0x90] sm:$0xff]  ;;  %v1397_v16 = vld [vmem:[#allocation11 + $0xe8] sm:$0xff] }
 0x14f   :  { %2323 = vmatprep.subr.bf16.mxu1 %v2304_v6  ;;  %v2391_v21 = vpack.c.bf16 %v1059_v20, %v1058_v19  ;;  %v1399_v19 = vld [vmem:[#allocation11 + $0xf8] sm:$0xff] }
 0x152   :  { %2325 = vmatpush3.bf16.msra.mxu1 %v2304_v6  ;;  %v902_v6 = vld [vmem:[#allocation10 + $0x60] sm:$0xff] }
 0x153   :  { %2327 = vmatprep.subr.bf16.mxu1 %v2326_v22  ;;  %v2379_v10 = vpack.c.bf16 %v903_v7, %v902_v6  ;;  %v1390_v6 = vld [vmem:[#allocation11 + $0xb0] sm:$0xff]  ;;  %v1391_v7 = vld [vmem:[#allocation11 + $0xb8] sm:$0xff] }
 0x155   :  { %2027 = vmatmul.mubr.msk.f32.vlgmr.msra.gmra.mrb[4].mxu1 %vm131_vm0, %v307_v25  ;;  %v1062_v25 = vld [vmem:[#allocation10 + $0xb0] sm:$0xff] }
 0x156   :  { %2329 = vmatpush3.bf16.msra.mxu1 %v2326_v22  ;;  %v1060_v22 = vld [vmem:[#allocation10 + $0xa0] sm:$0xff] }
 0x157   :  { %2332 = vmatprep.subr.msk.bf16.mxu1 %vm2869_vm3, %v2330_v26  ;;  %v2394_v24 = vpack.c.bf16 %v1061_v23, %v1060_v22  ;;  %v1547_v22 = vld [vmem:[#allocation11 + $0x100] sm:$0xff]  ;;  %v1548_v23 = vld [vmem:[#allocation11 + $0x108] sm:$0xff] }
 0x15a   :  { %2335 = vmatpush3.bf16.msk.msra.mxu1 %vm2869_vm3, %v2330_v26  ;;  %v1063_v26 = vld [vmem:[#allocation10 + $0xb8] sm:$0xff] }
 0x15b   :  { %2345 = vmatprep.subr.bf16.mxu1 %v2344_v29  ;;  %v2397_v27 = vpack.c.bf16 %v1063_v26, %v1062_v25  ;;  %v1844_v25 = vld [vmem:[%s3028_s7 + $0x4] sm:$0x3]  ;;  %v2448_v26 = vpack.c.bf16 %v1548_v23, %v1547_v22 }
 0x228   :  { %v2028_v34 = vpop.f32.mrb[4].mxu1 }
 0x229   :  { %v380_v35 = vpop.f32.mrb[5].mxu1 }
 0x22a   :  { %2037 = vmatprep.mubr.msk.f32.mxu1 %vm217_vm4, %v380_v35  ;;  %v1226_v35 = vld [vmem:[#allocation11 + $0x28] sm:$0xff] }
 0x22b   :  { %2038 = vmatmul.mubr.msk.f32.vlgmr.msra.gmra.mrb[2].mxu1 %vm217_vm4, %v2028_v34  ;;  %v1225_v34 = vld [vmem:[#allocation11 + $0x20] sm:$0xff] }
 0x22c   :  { %2347 = vmatpush3.bf16.msra.mxu1 %v2344_v29  ;;  %2059 = vmatprep.mubr.msk.f32.mxu1 %vm217_vm4, %v555_v31  ;;  %v1222_v29 = vld [vmem:[#allocation11 + $0x8] sm:$0xff] }
 0x22d   :  { %2350 = vmatprep.subr.msk.bf16.mxu1 %vm2869_vm3, %v2348_v36  ;;  %v2400_v31 = vpack.c.bf16 %v1222_v29, %v1221_v28  ;;  %v1549_v28 = vld [vmem:[#allocation11 + $0x110] sm:$0xff]  ;;  %v1550_v29 = vld [vmem:[#allocation11 + $0x118] sm:$0xff] }
 0x230   :  { %2353 = vmatpush3.bf16.msk.msra.mxu1 %vm2869_vm3, %v2348_v36  ;;  %v2406_v36 = vpack.c.bf16 %v1226_v35, %v1225_v34  ;;  %v1552_v34 = vld [vmem:[#allocation11 + $0x128] sm:$0xff] }
 0x231   :  { %2357 = vmatprep.subr.bf16.mxu1 %v2698_v37 }
 0x233   :  { %2060 = vmatmul.mubr.msk.f32.vlgmr.msra.gmra.mrb[2].mxu1 %vm217_vm4, %v2050_v30  ;;  %v1223_v30 = vld [vmem:[#allocation11 + $0x10] sm:$0xff] }
 0x234   :  { %2085 = vmatprep.mubr.msk.f32.mxu1 %vm2699_vm5, %v2700_v38  ;;  %2359 = vmatpush3.bf16.msra.mxu1 %v2358_v42  ;;  %v2403_v33 = vpack.c.bf16 %v1224_v32, %v1223_v30  ;;  %v1229_v42 = vld [vmem:[#allocation11 + $0x40] sm:$0xff]  ;;  %v2451_v32 = vpack.c.bf16 %v1550_v29, %v1549_v28 }
 0x235   :  { %2360 = vmatprep.subr.bf16.mxu1 %v2698_v37 }
 0x238   :  { %2362 = vmatpush3.bf16.msra.mxu1 %v2361_v44  ;;  %v2412_v44 = vpack.c.bf16 %v1230_v43, %v1229_v42  ;;  %v1556_v42 = vld [vmem:[#allocation11 + $0x148] sm:$0xff] }
 0x239   :  { %2363 = vmatprep.subr.bf16.mxu1 %v2698_v37 }
 0x23c   :  { %2365 = vmatpush3.bf16.msra.mxu1 %v2364_v47  ;;  %v2415_v47 = vpack.c.bf16 %v1232_v46, %v1231_v45  ;;  %v1558_v45 = vld [vmem:[#allocation11 + $0x158] sm:$0xff] }
 0x23d   :  { %2366 = vmatprep.subr.bf16.mxu1 %v2698_v37 }
 0x240   :  { %2368 = vmatpush3.bf16.msra.mxu1 %v2367_v50  ;;  %v2418_v50 = vpack.c.bf16 %v1234_v49, %v1233_v48  ;;  %v1560_v48 = vld [vmem:[#allocation11 + $0x168] sm:$0xff] }
 0x241   :  { %2372 = vmatprep.subr.bf16.mxu1 %v2698_v37 }
 0x306   :  { %v2061_v52 = vpop.f32.mrb[2].mxu1 }
 0x307   :  { %v2495_v53 = vadd.f32 %v2061_v52, %v1817_v51  ;;  %v644_v54 = vpop.f32.mrb[3].mxu1  ;;  %v1236_v52 = vld [vmem:[#allocation11 + $0x78] sm:$0xff] }
 0x308   :  { %v2496_v55 = vadd.f32 %v1817_v51, %v644_v54  ;;  %v1235_v51 = vld [vmem:[#allocation11 + $0x70] sm:$0xff]  ;;  %v1833_v54 = vld [vmem:[%s3027_s6] ss:$0 sm:$0xff] }
 0x309   :  { %v656_v56 = vmax.f32 %v2495_v53, 0.0  ;;  %v2421_v53 = vpack.c.bf16 %v1236_v52, %v1235_v51  ;;  %v1562_v51 = vld [vmem:[#allocation11 + $0x178] sm:$0xff] }
 0x30a   :  { %v655_v57 = vmax.f32 %v2496_v55, 0.0 }
 0x30c   :  { %v2355_v58 = vpack.c.bf16 %v656_v56, %v655_v57 }
 0x30e   :  { %2356 = vmatpush3.bf16.msra.mxu0 %v2355_v58 }
 0x30f   :  { %2369 = vmatprep.subr.bf16.mxu0 %v2698_v37 }
 0x311   :  { %2067 = vmatmul.mubr.msk.f32.vlgmr.msra.gmra.mrb[2].mxu0 %vm665_vm6, %v664_v59  ;;  %v1146_v59 = vld [vmem:[%s3028_s7] sm:$0x3] }
 0x312   :  { %2371 = vmatpush3.bf16.msra.mxu0 %v2355_v58  ;;  %2092 = vmatprep.mubr.msk.f32.mxu0 %vm2699_vm5, %v2700_v38 }
 0x313   :  { %2384 = vmatprep.subr.bf16.mxu0 %v2698_v37 }
 0x315   :  { %2093 = vmatmul.mubr.msk.f32.vlgmr.msra.gmra.mrb[4].mxu0 %vm665_vm6, %v823_v60  ;;  %v1842_v60 = vld [vmem:[%s3028_s7 + $0x2] sm:$0x3] }
 0x316   :  { %2386 = vmatpush3.bf16.msra.mxu0 %v2355_v58  ;;  %2118 = vmatprep.mubr.msk.f32.mxu0 %vm2699_vm5, %v2700_v38 }
 0x317   :  { %2140 = vmatprep.subr.mxu0 %v2700_v38 }
 0x319   :  { %2119 = vmatmul.mubr.msk.f32.vlgmr.msra.gmra.mrb[6].mxu0 %vm665_vm6, %v981_v61  ;;  %v1384_v61 = vld [vmem:[#allocation11 + $0x80] sm:$0xff] }
 0x31a   :  { %2142 = vmatprep.mubr.msk.f32.mxu0 %vm2699_vm5, %v2700_v38 }
 0x3e4   :  { %v735_v3 = vpop.f32.mrb[2].mxu0 }
 0x3e5   :  { %v2068_v4 = vpop.f32.mrb[3].mxu0  ;;  %2086 = vmatmul.mubr.msk.f32.vlgmr.msra.gmra.mrb[6].mxu1 %vm747_vm7, %v735_v3  ;;  %v1388_v3 = vld [vmem:[#allocation11 + $0xa0] sm:$0xff] }
 0x3e6   :  { %2374 = vmatpush3.bf16.msra.mxu1 %v2373_v0  ;;  %2111 = vmatprep.mubr.msk.f32.mxu1 %vm2699_vm5, %v2700_v38  ;;  %v2424_v0 = vpack.c.bf16 %v1385_v62, %v1384_v61  ;;  %v1389_v4 = vld [vmem:[#allocation11 + $0xa8] sm:$0xff] }
 0x3e7   :  { %2375 = vmatprep.subr.bf16.mxu1 %v2698_v37 }
 0x3e8   :  { %v893_v8 = vpop.f32.mrb[4].mxu0 }
 0x3e9   :  { %v2094_v9 = vpop.f32.mrb[5].mxu0 }
 0x3ea   :  { %2377 = vmatpush3.bf16.msra.mxu1 %v2376_v5  ;;  %v2430_v5 = vpack.c.bf16 %v1389_v4, %v1388_v3  ;;  %v1392_v9 = vld [vmem:[#allocation11 + $0xc0] sm:$0xff]  ;;  %v1716_v4 = vld [vmem:[#allocation11 + $0x1b0] sm:$0xff] }
 0x3eb   :  { %2378 = vmatprep.subr.bf16.mxu1 %v2698_v37 }
 0x3ec   :  { %v1051_v13 = vpop.f32.mrb[6].mxu0 }
 0x3ed   :  { %v2120_v14 = vpop.f32.mrb[7].mxu0 }
 0x3ee   :  { %2380 = vmatpush3.bf16.msra.mxu1 %v2379_v10  ;;  %v1393_v10 = vld [vmem:[#allocation11 + $0xc8] sm:$0xff] }
 0x3ef   :  { %2381 = vmatprep.subr.bf16.mxu1 %v2698_v37  ;;  %v2436_v11 = vpack.c.bf16 %v1393_v10, %v1392_v9  ;;  %v1720_v9 = vld [vmem:[#allocation11 + $0x1d0] sm:$0xff]  ;;  %v1721_v10 = vld [vmem:[#allocation11 + $0x1d8] sm:$0xff] }
 0x3f2   :  { %2383 = vmatpush3.bf16.msra.mxu1 %v2382_v15  ;;  %v1396_v15 = vld [vmem:[#allocation11 + $0xe0] sm:$0xff] }
 0x3f3   :  { %2387 = vmatprep.subr.bf16.mxu1 %v2698_v37  ;;  %v2442_v17 = vpack.c.bf16 %v1397_v16, %v1396_v15  ;;  %v1724_v15 = vld [vmem:[#allocation11 + $0x1f0] sm:$0xff]  ;;  %v1725_v16 = vld [vmem:[#allocation11 + $0x1f8] sm:$0xff] }
 0x3f5   :  { %2112 = vmatmul.mubr.msk.f32.vlgmr.msra.gmra.mrb[6].mxu1 %vm747_vm7, %v893_v8  ;;  %v2433_v8 = vpack.c.bf16 %v1391_v7, %v1390_v6  ;;  %v1718_v7 = vld [vmem:[#allocation11 + $0x1c0] sm:$0xff] }
 0x3f6   :  { %2389 = vmatpush3.bf16.msra.mxu1 %v2388_v18  ;;  %2137 = vmatprep.mubr.msk.f32.mxu1 %vm2699_vm5, %v2700_v38  ;;  %v1398_v18 = vld [vmem:[#allocation11 + $0xf0] sm:$0xff] }
 0x3f7   :  { %2390 = vmatprep.subr.bf16.mxu1 %v2698_v37  ;;  %v2445_v20 = vpack.c.bf16 %v1399_v19, %v1398_v18  ;;  %v1840_v18 = vld [vmem:[%s3030_s9] ss:$0 sm:$0xff] }
 0x3fa   :  { %2392 = vmatpush3.bf16.msra.mxu1 %v2391_v21 }
 0x3fb   :  { %2393 = vmatprep.subr.bf16.mxu1 %v2698_v37 }
 0x3fe   :  { %2395 = vmatpush3.bf16.msra.mxu1 %v2394_v24 }
 0x3ff   :  { %2396 = vmatprep.subr.bf16.mxu1 %v2698_v37 }
 0x402   :  { %2398 = vmatpush3.bf16.msra.mxu1 %v2397_v27 }
 0x403   :  { %2399 = vmatprep.subr.bf16.mxu1 %v2698_v37 }
 0x405   :  { %2138 = vmatmul.mubr.msk.f32.vlgmr.msra.gmra.mrb[6].mxu1 %vm747_vm7, %v1051_v13  ;;  %v1395_v13 = vld [vmem:[#allocation11 + $0xd8] sm:$0xff] }
 0x406   :  { %2177 = vmatprep.mubr.msk.f32.mxu1 %vm2699_vm5, %v2700_v38  ;;  %2401 = vmatpush3.bf16.msra.mxu1 %v2400_v31  ;;  %v2439_v14 = vpack.c.bf16 %v1395_v13, %v1394_v12  ;;  %v1846_v31 = vld [vmem:[%s3028_s7 + $0x6] sm:$0x3]  ;;  %v1722_v12 = vld [vmem:[#allocation11 + $0x1e0] sm:$0xff]  ;;  %v1723_v13 = vld [vmem:[#allocation11 + $0x1e8] sm:$0xff] }
 0x407   :  { %2402 = vmatprep.subr.bf16.mxu1 %v2698_v37 }
 0x40a   :  { %2404 = vmatpush3.bf16.msra.mxu1 %v2403_v33  ;;  %v1551_v33 = vld [vmem:[#allocation11 + $0x120] sm:$0xff] }
 0x40b   :  { %2405 = vmatprep.subr.bf16.mxu1 %v2698_v37  ;;  %v2454_v35 = vpack.c.bf16 %v1552_v34, %v1551_v33 }
 0x40e   :  { %2407 = vmatpush3.bf16.msra.mxu1 %v2406_v36  ;;  %v1553_v36 = vld [vmem:[#allocation11 + $0x130] sm:$0xff] }
 0x40f   :  { %2408 = vmatprep.subr.bf16.mxu1 %v2698_v37  ;;  %v2457_v40 = vpack.c.bf16 %v1554_v39, %v1553_v36 }
 0x412   :  { %2410 = vmatpush3.bf16.msra.mxu1 %v2409_v41  ;;  %v1555_v41 = vld [vmem:[#allocation11 + $0x140] sm:$0xff] }
 0x413   :  { %2411 = vmatprep.subr.bf16.mxu1 %v2698_v37  ;;  %v2460_v43 = vpack.c.bf16 %v1556_v42, %v1555_v41 }
 0x416   :  { %2413 = vmatpush3.bf16.msra.mxu1 %v2412_v44  ;;  %v1557_v44 = vld [vmem:[#allocation11 + $0x150] sm:$0xff] }
 0x417   :  { %2414 = vmatprep.subr.bf16.mxu1 %v2698_v37  ;;  %v2463_v46 = vpack.c.bf16 %v1558_v45, %v1557_v44 }
 0x41a   :  { %2416 = vmatpush3.bf16.msra.mxu1 %v2415_v47  ;;  %v1559_v47 = vld [vmem:[#allocation11 + $0x160] sm:$0xff] }
 0x41b   :  { %2417 = vmatprep.subr.bf16.mxu1 %v2698_v37  ;;  %v2466_v49 = vpack.c.bf16 %v1560_v48, %v1559_v47 }
 0x41e   :  { %2419 = vmatpush3.bf16.msra.mxu1 %v2418_v50  ;;  %v1561_v50 = vld [vmem:[#allocation11 + $0x170] sm:$0xff] }
 0x41f   :  { %2420 = vmatprep.subr.bf16.mxu1 %v2698_v37  ;;  %v2469_v52 = vpack.c.bf16 %v1562_v51, %v1561_v50 }
 0x422   :  { %2422 = vmatpush3.bf16.msra.mxu1 %v2421_v53  ;;  %v1710_v53 = vld [vmem:[#allocation11 + $0x180] sm:$0xff] }
 0x423   :  { %2220 = vmatprep.subr.mxu1 %v2700_v38 }
 0x4d8   :  { %v1133_v55 = vpop.f32.mrb[6].mxu1 }
 0x4d9   :  { %v2497_v56 = vadd.f32 %v1833_v54, %v1133_v55  ;;  %v2139_v57 = vpop.f32.mrb[7].mxu1  ;;  %v1711_v54 = vld [vmem:[#allocation11 + $0x188] sm:$0xff] }
 0x4da   :  { %v2472_v57 = vpack.c.bf16 %v1711_v54, %v1710_v53 }
 0x4db   :  { %v2946_v58 = vmax.f32 %v2497_v56, 0.0 }
 0x4dd   :  { %2141 = vmatpush3.msra.mxu0 %v2946_v58 }
 0x4de   :  { %2143 = vmatmul.mubr.msk.f32.vlgmr.msra.gmra.mrb[8].mxu0 %vm1147_vm8, %v1146_v59  ;;  %2180 = vmatprep.subr.mxu0 %v2700_v38  ;;  %v1713_v59 = vld [vmem:[#allocation11 + $0x198] sm:$0xff] }
 0x4df   :  { %2181 = vmatpush3.msra.mxu0 %v2946_v58  ;;  %2182 = vmatprep.mubr.msk.f32.mxu0 %vm2699_vm5, %v2700_v38 }
 0x4e0   :  { %2423 = vmatprep.subr.bf16.mxu0 %v2698_v37 }
 0x4e2   :  { %2183 = vmatmul.mubr.msk.f32.vlgmr.msra.gmra.mrb[10].mxu0 %vm1147_vm8, %v1842_v60 }
 0x4e3   :  { %2217 = vmatprep.mubr.msk.f32.mxu0 %vm2699_vm5, %v2700_v38  ;;  %2425 = vmatpush3.bf16.msra.mxu0 %v2424_v0  ;;  %v1715_v0 = vld [vmem:[#allocation11 + $0x1a8] sm:$0xff] }
 0x4e4   :  { %2426 = vmatprep.subr.bf16.mxu0 %v2698_v37  ;;  %v2478_v3 = vpack.c.bf16 %v1715_v0, %v1714_v63 }
 0x4e7   :  { %2428 = vmatpush3.bf16.msra.mxu0 %v2427_v2 }
 0x4e8   :  { %2429 = vmatprep.subr.bf16.mxu0 %v2698_v37 }
 0x4eb   :  { %2431 = vmatpush3.bf16.msra.mxu0 %v2430_v5  ;;  %v1717_v5 = vld [vmem:[#allocation11 + $0x1b8] sm:$0xff] }
 0x4ec   :  { %2432 = vmatprep.subr.bf16.mxu0 %v2698_v37  ;;  %v2481_v6 = vpack.c.bf16 %v1717_v5, %v1716_v4 }
 0x4ef   :  { %2434 = vmatpush3.bf16.msra.mxu0 %v2433_v8  ;;  %v1719_v8 = vld [vmem:[#allocation11 + $0x1c8] sm:$0xff] }
 0x4f0   :  { %2435 = vmatprep.subr.bf16.mxu0 %v2698_v37 }
 0x4f3   :  { %2437 = vmatpush3.bf16.msra.mxu0 %v2436_v11  ;;  %v2487_v11 = vpack.c.bf16 %v1721_v10, %v1720_v9 }
 0x4f4   :  { %2438 = vmatprep.subr.bf16.mxu0 %v2698_v37 }
 0x4f7   :  { %2440 = vmatpush3.bf16.msra.mxu0 %v2439_v14  ;;  %v2490_v14 = vpack.c.bf16 %v1723_v13, %v1722_v12 }
 0x4f8   :  { %2441 = vmatprep.subr.bf16.mxu0 %v2698_v37 }
 0x4fb   :  { %2443 = vmatpush3.bf16.msra.mxu0 %v2442_v17  ;;  %v2493_v17 = vpack.c.bf16 %v1725_v16, %v1724_v15 }
 0x4fc   :  { %2444 = vmatprep.subr.bf16.mxu0 %v2698_v37 }
 0x4ff   :  { %2446 = vmatpush3.bf16.msra.mxu0 %v2445_v20 }
 0x500   :  { %2447 = vmatprep.subr.bf16.mxu0 %v2698_v37 }
 0x5b1   :  { %v1217_v21 = vpop.f32.mrb[8].mxu0 }
 0x5b2   :  { %2178 = vmatmul.mubr.f32.vlgmr.msra.gmra.mrb[8].mxu1 %v1217_v21  ;;  %v2144_v24 = vpop.f32.mrb[9].mxu0 }
 0x5b3   :  { %2221 = vmatpush3.msra.mxu1 %v2946_v58  ;;  %2222 = vmatprep.mubr.msk.f32.mxu1 %vm2699_vm5, %v2700_v38 }
 0x5b4   :  { %2260 = vmatprep.subr.mxu1 %v2700_v38 }
 0x5b5   :  { %v1379_v27 = vpop.f32.mrb[10].mxu0 }
 0x5b6   :  { %2223 = vmatmul.mubr.msk.f32.vlgmr.msra.gmra.mrb[10].mxu1 %vm1147_vm8, %v1844_v25  ;;  %2218 = vmatmul.mubr.f32.vlgmr.msra.gmra.mrb[12].mxu0 %v1379_v27  ;;  %v2184_v30 = vpop.f32.mrb[11].mxu0 }
 0x5b7   :  { %2261 = vmatpush3.msra.mxu1 %v2946_v58  ;;  %2262 = vmatprep.mubr.msk.f32.mxu1 %vm2699_vm5, %v2700_v38  ;;  %v1712_v58 = vld [vmem:[#allocation11 + $0x190] sm:$0xff] }
 0x5b8   :  { %2449 = vmatpush3.bf16.msra.mxu0 %v2448_v26  ;;  %2257 = vmatprep.mubr.msk.f32.mxu0 %vm2699_vm5, %v2700_v38  ;;  %v2475_v62 = vpack.c.bf16 %v1713_v59, %v1712_v58 }
 0x5b9   :  { %2450 = vmatprep.subr.bf16.mxu0 %v2698_v37 }
 0x5ba   :  { %2263 = vmatmul.mubr.msk.f32.vlgmr.msra.gmra.mrb[12].mxu1 %vm1147_vm8, %v1846_v31 }
 0x5bc   :  { %2452 = vmatpush3.bf16.msra.mxu0 %v2451_v32 }
 0x5bd   :  { %2453 = vmatprep.subr.bf16.mxu0 %v2698_v37 }
 0x5c0   :  { %2455 = vmatpush3.bf16.msra.mxu0 %v2454_v35 }
 0x5c1   :  { %2456 = vmatprep.subr.bf16.mxu0 %v2698_v37 }
 0x5c4   :  { %2458 = vmatpush3.bf16.msra.mxu0 %v2457_v40 }
 0x5c5   :  { %2459 = vmatprep.subr.bf16.mxu0 %v2698_v37 }
 0x5c8   :  { %2461 = vmatpush3.bf16.msra.mxu0 %v2460_v43 }
 0x5c9   :  { %2462 = vmatprep.subr.bf16.mxu0 %v2698_v37 }
 0x5cc   :  { %2464 = vmatpush3.bf16.msra.mxu0 %v2463_v46 }
 0x5cd   :  { %2465 = vmatprep.subr.bf16.mxu0 %v2698_v37 }
 0x5d0   :  { %2467 = vmatpush3.bf16.msra.mxu0 %v2466_v49 }
 0x5d1   :  { %2468 = vmatprep.subr.bf16.mxu0 %v2698_v37 }
 0x5d4   :  { %2470 = vmatpush3.bf16.msra.mxu0 %v2469_v52 }
 0x5d5   :  { %2471 = vmatprep.subr.bf16.mxu0 %v2698_v37 }
 0x685   :  { %v1303_v55 = vpop.f32.mrb[8].mxu1 }
 0x686   :  { %v2179_v56 = vpop.f32.mrb[9].mxu1  ;;  %v1307_v19 = vadd.f32 %v1840_v18, %v1303_v55 }
 0x689   :  { %v1542_v60 = vpop.f32.mrb[10].mxu1 }
 0x68a   :  { %2258 = vmatmul.mubr.f32.vlgmr.msra.gmra.mrb[12].mxu0 %v1542_v60  ;;  %v2224_v61 = vpop.f32.mrb[11].mxu1 }
 0x68b   :  { %2473 = vmatpush3.bf16.msra.mxu0 %v2472_v57  ;;  %2297 = vmatprep.mubr.msk.f32.mxu0 %vm2699_vm5, %v2700_v38  ;;  %v2484_v38 = vpack.c.bf16 %v1719_v8, %v1718_v7 }
 0x68c   :  { %2474 = vmatprep.subr.bf16.mxu0 %v2698_v37 }
 0x68d   :  { %v1705_v1 = vpop.f32.mrb[12].mxu1 }
 0x68e   :  { %v2264_v2 = vpop.f32.mrb[13].mxu1 }
 0x68f   :  { %2476 = vmatpush3.bf16.msra.mxu0 %v2475_v62 }
 0x690   :  { %2477 = vmatprep.subr.bf16.mxu0 %v2698_v37 }
 0x693   :  { %2479 = vmatpush3.bf16.msra.mxu0 %v2478_v3 }
 0x694   :  { %2480 = vmatprep.subr.bf16.mxu0 %v2698_v37 }
 0x697   :  { %2482 = vmatpush3.bf16.msra.mxu0 %v2481_v6 }
 0x698   :  { %2483 = vmatprep.subr.bf16.mxu0 %v2698_v37 }
 0x69b   :  { %2485 = vmatpush3.bf16.msra.mxu0 %v2484_v38 }
 0x69c   :  { %2486 = vmatprep.subr.bf16.mxu0 %v2698_v37 }
 0x69f   :  { %2488 = vmatpush3.bf16.msra.mxu0 %v2487_v11 }
 0x6a0   :  { %2489 = vmatprep.subr.bf16.mxu0 %v2698_v37 }
 0x6a3   :  { %2491 = vmatpush3.bf16.msra.mxu0 %v2490_v14 }
 0x6a4   :  { %2492 = vmatprep.subr.bf16.mxu0 %v2698_v37 }
 0x6a7   :  { %2494 = vmatpush3.bf16.msra.mxu0 %v2493_v17 }
 0x6aa   :  { %2298 = vmatmul.mubr.f32.vlgmr.msra.gmra.mrb[12].mxu0 %v1705_v1 }
 0x77d   :  { %v1792_v20 = vpop.f32.mrb[12].mxu0 }
 0x77e   :  { %v2499_v21 = vadd.f32 %v1792_v20, %v1307_v19  ;;  %v2299_v22 = vpop.f32.mrb[13].mxu0 }
 0x780   :  { %v1797_v23 = vmax.f32 %v2499_v21, 0.0 }
 0x782   :  { %1798 = vst [vmem:[#allocation13] sm:$0x3] %v1797_v23 }
 0x783   :  { %2668 = shalt.err (!%p2665_p10)
}
 0x784   :  { %s2669_s9 = scalar_lea.hbm %s3031_s10, 32 }
 0x785   :  { %p2670_p11 = scmp.ne.s32.totalorder %s3031_s10, %s2669_s9  ;;  %p2673_p12 = scmp.lt.u32.totalorder %s2669_s9, %s3031_s10 }
 0x787   :  { %p2675_p13 = pnand %p2673_p12, %p2670_p11 }
 0x789   :  { %2678 = shalt.err (!%p2675_p13)
}
 0x78a   :  { %1808 = dma.vmem_to_hbm [thread:$0]  %s1806_s13, 32, %s3031_s10, [#allocation4]  }
 0x78b   :  { %2687 = dma.done.wait [#allocation4], 32  }
 0x78c   :  { %2688 = vsyncadd [#allocation4], 4294967264 }
 0x78d   :  { %1812 = vsyncpa [#allocation3], 1 }
 0x78e   :  { %1813 = vsyncpa [#allocation6], 1 }
 0x78f   :  { %1814 = vsyncpa [#allocation9], 1 }
 0x790   :  { %1815 = vsyncpa [#allocation12], 1 }
 0x791   :  { %1816 = vsyncpa [#allocation4], 1 }

</bundles_post_ra>
